<compile_context>
chip_gen: v5e
topology: v5e:2x2
jax: 0.10.0
libtpu: 0.0.40
codegen_flags: <defaults>
</compile_context>

<pallas_src>
import functools
import math

import jax
import jax.numpy as jnp
from jax.experimental import pallas as pl
from jax.experimental.pallas import tpu as pltpu


def _round_up(v, m):
    return (v + m - 1) // m * m


def _vmem_capacity_bytes():
    """Physical per-core VMEM; conservative 64 MiB (v7x) fallback."""
    try:
        info = pltpu.get_tpu_info()
        cap = getattr(info, "vmem_capacity_bytes", None)
        if cap:
            return int(cap)
    except Exception:
        pass
    return 64 * 1024 * 1024


def _lddt_head_kernel(x_ref, g_ref, beta_ref,
                      w1_ref, b1_ref, w2_ref, b2_ref, w3_ref, b3_ref,
                      o_ref, *, eps, c_in):
    """One row tile: LayerNorm (f32) + 3 MXU matmuls with f32 accumulation."""
    x = x_ref[...].astype(jnp.float32)                       # [tm, c_pad]; pad lanes are 0
    inv_c = 1.0 / float(c_in)
    mean = jnp.sum(x, axis=-1, keepdims=True) * inv_c        # exact (pad lanes are 0)
    ex2 = jnp.sum(x * x, axis=-1, keepdims=True) * inv_c
    var = jnp.maximum(ex2 - mean * mean, 0.0)                # single-pass variance
    inv = jax.lax.rsqrt(var + eps)
    # Padded lanes: (0 - mean) * inv * gamma_pad(0) + beta_pad(0) = 0, so the
    # MXU input stays clean without any per-step lane mask.
    h = (x - mean) * inv * g_ref[...].astype(jnp.float32) + beta_ref[...].astype(jnp.float32)

    mm_dtype = w1_ref.dtype                                  # bf16 (or f32) MXU inputs

    h = jnp.dot(h.astype(mm_dtype), w1_ref[...],
                preferred_element_type=jnp.float32) + b1_ref[...]
    h = jnp.maximum(h, 0.0)
    h = jnp.dot(h.astype(mm_dtype), w2_ref[...],
                preferred_element_type=jnp.float32) + b2_ref[...]
    h = jnp.maximum(h, 0.0)
    logits = jnp.dot(h.astype(mm_dtype), w3_ref[...],
                     preferred_element_type=jnp.float32) + b3_ref[...]
    o_ref[...] = logits.astype(o_ref.dtype)


def lddt_head_forward(x, params, *, num_atoms, num_bins, eps=1e-5,
                      use_bf16=True, out_dtype=None):
    """x: [*, c_in]  ->  logits: [*, num_atoms, num_bins]"""
    lead_shape = x.shape[:-1]
    c_in = x.shape[-1]
    n = math.prod(lead_shape) if lead_shape else 1
    hidden = params["w1"].shape[1]
    out_dim = num_atoms * num_bins
    assert params["w3"].shape[1] == out_dim, "w3 out dim must equal num_atoms*num_bins"

    io_dtype = jnp.bfloat16 if use_bf16 else jnp.float32
    w_dtype = jnp.bfloat16 if use_bf16 else jnp.float32
    if out_dtype is None:
        out_dtype = jnp.bfloat16 if use_bf16 else x.dtype

    c_pad = _round_up(c_in, 128)          # lane-dense LN / matmul K dim
    h_pad = _round_up(hidden, 128)        # lane-dense hidden dim
    o_lane = _round_up(out_dim, 128)      # VMEM-accounting only; output stays unpadded

    def pad2(a, rows, cols, dtype):
        a = a.reshape((-1, a.shape[-1])) if a.ndim > 1 else a.reshape(1, -1)
        return jnp.pad(a, ((0, rows - a.shape[0]), (0, cols - a.shape[1]))).astype(dtype)

    gamma = pad2(params["gamma"], 1, c_pad, jnp.float32)
    beta = pad2(params["beta"], 1, c_pad, jnp.float32)
    w1 = pad2(params["w1"], c_pad, h_pad, w_dtype)
    b1 = pad2(params["b1"], 1, h_pad, jnp.float32)
    w2 = pad2(params["w2"], h_pad, h_pad, w_dtype)
    b2 = pad2(params["b2"], 1, h_pad, jnp.float32)
    w3 = pad2(params["w3"], h_pad, out_dim, w_dtype)
    b3 = pad2(params["b3"], 1, out_dim, jnp.float32)
    weight_bytes = sum(int(a.size) * a.dtype.itemsize
                       for a in (gamma, beta, w1, b1, w2, b2, w3, b3))

    # bf16 HBM I/O for the big row tensor; channel pad is a no-op when c_in is
    # already a multiple of 128 (e.g. the module default c_in=384).
    x2p = jnp.pad(x.reshape(n, c_in).astype(io_dtype), ((0, 0), (0, c_pad - c_in)))

    # ---- per-generation row tile / VMEM budget ------------------------------
    cap = int(0.75 * _vmem_capacity_bytes())      # ~48 MiB v7x, ~96 MiB v5e/v6e
    in_item = jnp.dtype(io_dtype).itemsize
    out_item = jnp.dtype(out_dtype).itemsize
    row_align = 16 if in_item == 2 else 8

    def footprint(tm):
        tiles = 2 * tm * (c_pad * in_item + o_lane * out_item)   # double-buffered x/out
        interm = tm * (2 * c_pad + 2 * h_pad + o_lane) * 4       # f32 temporaries
        return tiles + 2 * weight_bytes + interm                 # weights (worst case 2x)

    tm = row_align
    for cand in (1024, 512, 256, 128):
        if int(1.5 * footprint(cand)) + (4 << 20) <= cap:
            tm = cand
            break
    # Guarantee >=4 grid steps where possible (DMA pipelining + v7x megacore).
    min_steps = 4
    if pl.cdiv(n, tm) < min_steps:
        tm = max(row_align, _round_up(pl.cdiv(n, min_steps), row_align))
    grid_m = pl.cdiv(n, tm)               # partial last row block is allowed

    vmem_limit = int(min(cap, max(int(1.5 * footprint(tm)) + (4 << 20), 32 << 20)))

    flops = 2 * n * (c_pad * h_pad + h_pad * h_pad + h_pad * out_dim)
    cost = pl.CostEstimate(
        flops=flops, transcendentals=n,
        bytes_accessed=int(x2p.size * in_item + n * out_dim * out_item + weight_bytes))

    kernel = functools.partial(_lddt_head_kernel, eps=eps, c_in=c_in)

    def row_map(i):
        return (i, 0)

    def fixed_map(i):
        return (0, 0)

    def run(single_buffer_weights):
        def cspec(shape):
            if single_buffer_weights:
                # Constant index_map -> DMA'd once; one VMEM buffer is enough.
                return pl.BlockSpec(shape, fixed_map, pipeline_mode=pl.Buffered(1))
            return pl.BlockSpec(shape, fixed_map)

        return pl.pallas_call(
            kernel,
            out_shape=jax.ShapeDtypeStruct((n, out_dim), out_dtype),
            grid_spec=pltpu.PrefetchScalarGridSpec(
                num_scalar_prefetch=0,
                grid=(grid_m,),
                in_specs=[
                    pl.BlockSpec((tm, c_pad), row_map),   # x row tile
                    cspec((1, c_pad)),                    # LN gamma
                    cspec((1, c_pad)),                    # LN beta
                    cspec((c_pad, h_pad)),                # w1
                    cspec((1, h_pad)),                    # b1
                    cspec((h_pad, h_pad)),                # w2
                    cspec((1, h_pad)),                    # b2
                    cspec((h_pad, out_dim)),              # w3
                    cspec((1, out_dim)),                  # b3
                ],
                out_specs=pl.BlockSpec((tm, out_dim), row_map),
            ),
            compiler_params=pltpu.CompilerParams(
                dimension_semantics=("parallel",),
                vmem_limit_bytes=vmem_limit),
            cost_estimate=cost,
        )(x2p, gamma, beta, w1, b1, w2, b2, w3, b3)

    try:
        out = run(True)
    except Exception:
        # pipeline_mode=pl.Buffered(1) unsupported in this jax build -> default
        # double-buffered constants (costs ~weight_bytes of extra VMEM only).
        out = run(False)

    return out.reshape(lead_shape + (num_atoms, num_bins))


def init_params(key, c_in, hidden, num_atoms, num_bins, dtype=jnp.float32):
    """Synthetic params matching the module's shapes ('relu' init for linear_1/2;
    linear_3 would be zero-init in AF2 — tiny random values keep the test non-trivial)."""
    k = jax.random.split(key, 3)
    out_dim = num_atoms * num_bins
    return {
        "gamma": jnp.ones((1, c_in), dtype),
        "beta": jnp.zeros((1, c_in), dtype),
        "w1": (jax.random.normal(k[0], (c_in, hidden), jnp.float32)
               * jnp.sqrt(2.0 / c_in)).astype(dtype),
        "b1": jnp.zeros((1, hidden), dtype),
        "w2": (jax.random.normal(k[1], (hidden, hidden), jnp.float32)
               * jnp.sqrt(2.0 / hidden)).astype(dtype),
        "b2": jnp.zeros((1, hidden), dtype),
        "w3": (jax.random.normal(k[2], (hidden, out_dim), jnp.float32)
               * 0.01).astype(dtype),
        "b3": jnp.zeros((1, out_dim), dtype),
    }


def lddt_head_reference(x, params, *, num_atoms, num_bins, eps=1e-5, use_bf16=True):
    """Pure-JAX reference mirroring the kernel numerics (bf16 I/O + MXU inputs,
    f32 LN and accumulation)."""
    xf = x.astype(jnp.bfloat16).astype(jnp.float32) if use_bf16 else x.astype(jnp.float32)
    mean = jnp.mean(xf, axis=-1, keepdims=True)
    var = jnp.maximum(jnp.mean(xf * xf, axis=-1, keepdims=True) - mean * mean, 0.0)
    h = (xf - mean) * jax.lax.rsqrt(var + eps) * params["gamma"].reshape(-1) \
        + params["beta"].reshape(-1)

    mmd = jnp.bfloat16 if use_bf16 else jnp.float32

    def mm(a, w):
        return jnp.dot(a.astype(mmd), w.astype(mmd), preferred_element_type=jnp.float32)

    h = jnp.maximum(mm(h, params["w1"]) + params["b1"].reshape(-1), 0.0)
    h = jnp.maximum(mm(h, params["w2"]) + params["b2"].reshape(-1), 0.0)
    logits = mm(h, params["w3"]) + params["b3"].reshape(-1)
    return logits.reshape(x.shape[:-1] + (num_atoms, num_bins))


if __name__ == "__main__":
    key = jax.random.PRNGKey(0)

    def check(batch, seq, c_in, hidden, num_atoms, num_bins, k):
        kx, kp = jax.random.split(k)
        x = jax.random.normal(kx, (batch, seq, c_in), jnp.float32)
        params = init_params(kp, c_in, hidden, num_atoms, num_bins)
        out = jax.block_until_ready(
            lddt_head_forward(x, params, num_atoms=num_atoms, num_bins=num_bins))
        ref = lddt_head_reference(x, params, num_atoms=num_atoms, num_bins=num_bins)
        assert out.shape == (batch, seq, num_atoms, num_bins), out.shape
        of = out.astype(jnp.float32)
        assert bool(jnp.isfinite(of).all()), "non-finite logits"
        err = float(jnp.max(jnp.abs(of - ref)))
        assert jnp.allclose(of, ref, atol=2e-2, rtol=2e-2), f"mismatch vs reference: {err}"

    k1, k2 = jax.random.split(key)
    # Small single-tile case (module defaults scaled down): batch=2, seq=8.
    check(batch=2, seq=8, c_in=32, hidden=32, num_atoms=1, num_bins=50, k=k1)
    # Multi-tile case: grid > 1, partial final row block, c_in/out_dim not
    # multiples of 128, num_atoms > 1 (validates weight residency across steps).
    check(batch=3, seq=200, c_in=48, hidden=64, num_atoms=2, num_bins=50, k=k2)

    print("KERNEL_OK")
</pallas_src>

<mosaic_0001>
module attributes {stable_mosaic.version = 11 : i64} {
  func.func @_lddt_head_kernel(%arg0: i32, %arg1: memref<16x128xbf16, #tpu.memory_space<vmem>>, %arg2: memref<1x128xf32, #tpu.memory_space<vmem>>, %arg3: memref<1x128xf32, #tpu.memory_space<vmem>>, %arg4: memref<128x128xbf16, #tpu.memory_space<vmem>>, %arg5: memref<1x128xf32, #tpu.memory_space<vmem>>, %arg6: memref<128x128xbf16, #tpu.memory_space<vmem>>, %arg7: memref<1x128xf32, #tpu.memory_space<vmem>>, %arg8: memref<128x50xbf16, #tpu.memory_space<vmem>>, %arg9: memref<1x50xf32, #tpu.memory_space<vmem>>, %arg10: memref<16x50xbf16, #tpu.memory_space<vmem>>) attributes {dimension_semantics = [#tpu.dimension_semantics<parallel>], iteration_bounds = array<i64: 1>, scalar_prefetch = 0 : i64, scratch_operands = 0 : i64, tpu.core_type = #tpu.core_type<tc>, window_params = [{transform_indices = @transform_0, window_bounds = array<i64: 16, 128>}, {pipeline_mode = #tpu.pipeline_mode<synchronous>, transform_indices = @transform_1, window_bounds = array<i64: 1, 128>}, {pipeline_mode = #tpu.pipeline_mode<synchronous>, transform_indices = @transform_2, window_bounds = array<i64: 1, 128>}, {pipeline_mode = #tpu.pipeline_mode<synchronous>, transform_indices = @transform_3, window_bounds = array<i64: 128, 128>}, {pipeline_mode = #tpu.pipeline_mode<synchronous>, transform_indices = @transform_4, window_bounds = array<i64: 1, 128>}, {pipeline_mode = #tpu.pipeline_mode<synchronous>, transform_indices = @transform_5, window_bounds = array<i64: 128, 128>}, {pipeline_mode = #tpu.pipeline_mode<synchronous>, transform_indices = @transform_6, window_bounds = array<i64: 1, 128>}, {pipeline_mode = #tpu.pipeline_mode<synchronous>, transform_indices = @transform_7, window_bounds = array<i64: 128, 50>}, {pipeline_mode = #tpu.pipeline_mode<synchronous>, transform_indices = @transform_8, window_bounds = array<i64: 1, 50>}, {transform_indices = @transform_9, window_bounds = array<i64: 16, 50>}]} {
    %c0 = arith.constant 0 : index
    %c0_0 = arith.constant 0 : index
    %0 = vector.load %arg1[%c0, %c0_0] : memref<16x128xbf16, #tpu.memory_space<vmem>>, vector<16x128xbf16>
    %1 = arith.extf %0 : vector<16x128xbf16> to vector<16x128xf32>
    %cst = arith.constant dense<0.000000e+00> : vector<16xf32>
    %2 = vector.multi_reduction <add>, %1, %cst [1] : vector<16x128xf32> to vector<16xf32>
    %3 = vector.shape_cast %2 : vector<16xf32> to vector<16x1xf32>
    %cst_1 = arith.constant 3.125000e-02 : f32
    %4 = vector.broadcast %cst_1 : f32 to vector<16x1xf32>
    %5 = arith.mulf %3, %4 : vector<16x1xf32>
    %6 = arith.mulf %1, %1 : vector<16x128xf32>
    %cst_2 = arith.constant dense<0.000000e+00> : vector<16xf32>
    %7 = vector.multi_reduction <add>, %6, %cst_2 [1] : vector<16x128xf32> to vector<16xf32>
    %8 = vector.shape_cast %7 : vector<16xf32> to vector<16x1xf32>
    %cst_3 = arith.constant 3.125000e-02 : f32
    %9 = vector.broadcast %cst_3 : f32 to vector<16x1xf32>
    %10 = arith.mulf %8, %9 : vector<16x1xf32>
    %11 = arith.mulf %5, %5 : vector<16x1xf32>
    %12 = arith.subf %10, %11 : vector<16x1xf32>
    %cst_4 = arith.constant 0.000000e+00 : f32
    %13 = vector.broadcast %cst_4 : f32 to vector<16x1xf32>
    %14 = arith.maximumf %12, %13 : vector<16x1xf32>
    %cst_5 = arith.constant 9.99999974E-6 : f32
    %15 = vector.broadcast %cst_5 : f32 to vector<16x1xf32>
    %16 = arith.addf %14, %15 : vector<16x1xf32>
    %17 = math.rsqrt %16 : vector<16x1xf32>
    %18 = vector.broadcast %5 : vector<16x1xf32> to vector<16x128xf32>
    %19 = arith.subf %1, %18 : vector<16x128xf32>
    %20 = vector.broadcast %17 : vector<16x1xf32> to vector<16x128xf32>
    %21 = arith.mulf %19, %20 : vector<16x128xf32>
    %c0_6 = arith.constant 0 : index
    %c0_7 = arith.constant 0 : index
    %22 = vector.load %arg2[%c0_6, %c0_7] : memref<1x128xf32, #tpu.memory_space<vmem>>, vector<1x128xf32>
    %23 = vector.broadcast %22 : vector<1x128xf32> to vector<16x128xf32>
    %24 = arith.mulf %21, %23 : vector<16x128xf32>
    %c0_8 = arith.constant 0 : index
    %c0_9 = arith.constant 0 : index
    %25 = vector.load %arg3[%c0_8, %c0_9] : memref<1x128xf32, #tpu.memory_space<vmem>>, vector<1x128xf32>
    %26 = vector.broadcast %25 : vector<1x128xf32> to vector<16x128xf32>
    %27 = arith.addf %24, %26 : vector<16x128xf32>
    %28 = arith.truncf %27 : vector<16x128xf32> to vector<16x128xbf16>
    %c0_10 = arith.constant 0 : index
    %c0_11 = arith.constant 0 : index
    %29 = vector.load %arg4[%c0_10, %c0_11] : memref<128x128xbf16, #tpu.memory_space<vmem>>, vector<128x128xbf16>
    %cst_12 = arith.constant dense<0.000000e+00> : vector<16x128xf32>
    %30 = tpu.matmul %28, %29, %cst_12 {dimension_numbers = #tpu.dot_dimension_numbers<[1], [0], [0], [1], [0, 0, 1, 1], [], []>} : vector<16x128xbf16>, vector<128x128xbf16>, vector<16x128xf32> -> vector<16x128xf32>
    %c0_13 = arith.constant 0 : index
    %c0_14 = arith.constant 0 : index
    %31 = vector.load %arg5[%c0_13, %c0_14] : memref<1x128xf32, #tpu.memory_space<vmem>>, vector<1x128xf32>
    %32 = vector.broadcast %31 : vector<1x128xf32> to vector<16x128xf32>
    %33 = arith.addf %30, %32 : vector<16x128xf32>
    %cst_15 = arith.constant 0.000000e+00 : f32
    %34 = vector.broadcast %cst_15 : f32 to vector<16x128xf32>
    %35 = arith.maximumf %33, %34 : vector<16x128xf32>
    %36 = arith.truncf %35 : vector<16x128xf32> to vector<16x128xbf16>
    %c0_16 = arith.constant 0 : index
    %c0_17 = arith.constant 0 : index
    %37 = vector.load %arg6[%c0_16, %c0_17] : memref<128x128xbf16, #tpu.memory_space<vmem>>, vector<128x128xbf16>
    %cst_18 = arith.constant dense<0.000000e+00> : vector<16x128xf32>
    %38 = tpu.matmul %36, %37, %cst_18 {dimension_numbers = #tpu.dot_dimension_numbers<[1], [0], [0], [1], [0, 0, 1, 1], [], []>} : vector<16x128xbf16>, vector<128x128xbf16>, vector<16x128xf32> -> vector<16x128xf32>
    %c0_19 = arith.constant 0 : index
    %c0_20 = arith.constant 0 : index
    %39 = vector.load %arg7[%c0_19, %c0_20] : memref<1x128xf32, #tpu.memory_space<vmem>>, vector<1x128xf32>
    %40 = vector.broadcast %39 : vector<1x128xf32> to vector<16x128xf32>
    %41 = arith.addf %38, %40 : vector<16x128xf32>
    %cst_21 = arith.constant 0.000000e+00 : f32
    %42 = vector.broadcast %cst_21 : f32 to vector<16x128xf32>
    %43 = arith.maximumf %41, %42 : vector<16x128xf32>
    %44 = arith.truncf %43 : vector<16x128xf32> to vector<16x128xbf16>
    %c0_22 = arith.constant 0 : index
    %c0_23 = arith.constant 0 : index
    %45 = vector.load %arg8[%c0_22, %c0_23] : memref<128x50xbf16, #tpu.memory_space<vmem>>, vector<128x50xbf16>
    %cst_24 = arith.constant dense<0.000000e+00> : vector<16x50xf32>
    %46 = tpu.matmul %44, %45, %cst_24 {dimension_numbers = #tpu.dot_dimension_numbers<[1], [0], [0], [1], [0, 0, 1, 1], [], []>} : vector<16x128xbf16>, vector<128x50xbf16>, vector<16x50xf32> -> vector<16x50xf32>
    %c0_25 = arith.constant 0 : index
    %c0_26 = arith.constant 0 : index
    %47 = vector.load %arg9[%c0_25, %c0_26] : memref<1x50xf32, #tpu.memory_space<vmem>>, vector<1x50xf32>
    %48 = vector.broadcast %47 : vector<1x50xf32> to vector<16x50xf32>
    %49 = arith.addf %46, %48 : vector<16x50xf32>
    %50 = arith.truncf %49 : vector<16x50xf32> to vector<16x50xbf16>
    %c0_27 = arith.constant 0 : index
    %c0_28 = arith.constant 0 : index
    %51 = vector.load %arg10[%c0_27, %c0_28] : memref<16x50xbf16, #tpu.memory_space<vmem>>, vector<16x50xbf16>
    tpu.vector_store %arg10[%c0_27, %c0_28], %50 {strides = array<i32>} : memref<16x50xbf16, #tpu.memory_space<vmem>>, vector<16x50xbf16>,
    return
  }
  func.func @transform_0(%arg0: i32) -> (i32, i32) {
    %c0_i32 = arith.constant 0 : i32
    %c0_i32_0 = arith.constant 0 : i32
    return %arg0, %c0_i32 : i32, i32
  }
  func.func @transform_1(%arg0: i32) -> (i32, i32) {
    %c0_i32 = arith.constant 0 : i32
    %c0_i32_0 = arith.constant 0 : i32
    %c0_i32_1 = arith.constant 0 : i32
    return %c0_i32, %c0_i32_0 : i32, i32
  }
  func.func @transform_2(%arg0: i32) -> (i32, i32) {
    %c0_i32 = arith.constant 0 : i32
    %c0_i32_0 = arith.constant 0 : i32
    %c0_i32_1 = arith.constant 0 : i32
    return %c0_i32, %c0_i32_0 : i32, i32
  }
  func.func @transform_3(%arg0: i32) -> (i32, i32) {
    %c0_i32 = arith.constant 0 : i32
    %c0_i32_0 = arith.constant 0 : i32
    %c0_i32_1 = arith.constant 0 : i32
    return %c0_i32, %c0_i32_0 : i32, i32
  }
  func.func @transform_4(%arg0: i32) -> (i32, i32) {
    %c0_i32 = arith.constant 0 : i32
    %c0_i32_0 = arith.constant 0 : i32
    %c0_i32_1 = arith.constant 0 : i32
    return %c0_i32, %c0_i32_0 : i32, i32
  }
  func.func @transform_5(%arg0: i32) -> (i32, i32) {
    %c0_i32 = arith.constant 0 : i32
    %c0_i32_0 = arith.constant 0 : i32
    %c0_i32_1 = arith.constant 0 : i32
    return %c0_i32, %c0_i32_0 : i32, i32
  }
  func.func @transform_6(%arg0: i32) -> (i32, i32) {
    %c0_i32 = arith.constant 0 : i32
    %c0_i32_0 = arith.constant 0 : i32
    %c0_i32_1 = arith.constant 0 : i32
    return %c0_i32, %c0_i32_0 : i32, i32
  }
  func.func @transform_7(%arg0: i32) -> (i32, i32) {
    %c0_i32 = arith.constant 0 : i32
    %c0_i32_0 = arith.constant 0 : i32
    %c0_i32_1 = arith.constant 0 : i32
    return %c0_i32, %c0_i32_0 : i32, i32
  }
  func.func @transform_8(%arg0: i32) -> (i32, i32) {
    %c0_i32 = arith.constant 0 : i32
    %c0_i32_0 = arith.constant 0 : i32
    %c0_i32_1 = arith.constant 0 : i32
    return %c0_i32, %c0_i32_0 : i32, i32
  }
  func.func @transform_9(%arg0: i32) -> (i32, i32) {
    %c0_i32 = arith.constant 0 : i32
    %c0_i32_0 = arith.constant 0 : i32
    return %arg0, %c0_i32 : i32, i32
  }
}

module attributes {stable_mosaic.version = 11 : i64} {
  func.func @_lddt_head_kernel(%arg0: i32, %arg1: memref<16x128xbf16, #tpu.memory_space<vmem>>, %arg2: memref<1x128xf32, #tpu.memory_space<vmem>>, %arg3: memref<1x128xf32, #tpu.memory_space<vmem>>, %arg4: memref<128x128xbf16, #tpu.memory_space<vmem>>, %arg5: memref<1x128xf32, #tpu.memory_space<vmem>>, %arg6: memref<128x128xbf16, #tpu.memory_space<vmem>>, %arg7: memref<1x128xf32, #tpu.memory_space<vmem>>, %arg8: memref<128x50xbf16, #tpu.memory_space<vmem>>, %arg9: memref<1x50xf32, #tpu.memory_space<vmem>>, %arg10: memref<16x50xbf16, #tpu.memory_space<vmem>>) attributes {dimension_semantics = [#tpu.dimension_semantics<parallel>], iteration_bounds = array<i64: 1>, scalar_prefetch = 0 : i64, scratch_operands = 0 : i64, tpu.core_type = #tpu.core_type<tc>, window_params = [{transform_indices = @transform_0, window_bounds = array<i64: 16, 128>}, {pipeline_mode = #tpu.pipeline_mode<synchronous>, transform_indices = @transform_1, window_bounds = array<i64: 1, 128>}, {pipeline_mode = #tpu.pipeline_mode<synchronous>, transform_indices = @transform_2, window_bounds = array<i64: 1, 128>}, {pipeline_mode = #tpu.pipeline_mode<synchronous>, transform_indices = @transform_3, window_bounds = array<i64: 128, 128>}, {pipeline_mode = #tpu.pipeline_mode<synchronous>, transform_indices = @transform_4, window_bounds = array<i64: 1, 128>}, {pipeline_mode = #tpu.pipeline_mode<synchronous>, transform_indices = @transform_5, window_bounds = array<i64: 128, 128>}, {pipeline_mode = #tpu.pipeline_mode<synchronous>, transform_indices = @transform_6, window_bounds = array<i64: 1, 128>}, {pipeline_mode = #tpu.pipeline_mode<synchronous>, transform_indices = @transform_7, window_bounds = array<i64: 128, 50>}, {pipeline_mode = #tpu.pipeline_mode<synchronous>, transform_indices = @transform_8, window_bounds = array<i64: 1, 50>}, {transform_indices = @transform_9, window_bounds = array<i64: 16, 50>}]} {
    %c0 = arith.constant 0 : index
    %c0_0 = arith.constant 0 : index
    %0 = vector.load %arg1[%c0, %c0_0] : memref<16x128xbf16, #tpu.memory_space<vmem>>, vector<16x128xbf16>
    %1 = arith.extf %0 : vector<16x128xbf16> to vector<16x128xf32>
    %cst = arith.constant dense<0.000000e+00> : vector<16xf32>
    %2 = vector.multi_reduction <add>, %1, %cst [1] : vector<16x128xf32> to vector<16xf32>
    %3 = vector.shape_cast %2 : vector<16xf32> to vector<16x1xf32>
    %cst_1 = arith.constant 3.125000e-02 : f32
    %4 = vector.broadcast %cst_1 : f32 to vector<16x1xf32>
    %5 = arith.mulf %3, %4 : vector<16x1xf32>
    %6 = arith.mulf %1, %1 : vector<16x128xf32>
    %cst_2 = arith.constant dense<0.000000e+00> : vector<16xf32>
    %7 = vector.multi_reduction <add>, %6, %cst_2 [1] : vector<16x128xf32> to vector<16xf32>
    %8 = vector.shape_cast %7 : vector<16xf32> to vector<16x1xf32>
    %cst_3 = arith.constant 3.125000e-02 : f32
    %9 = vector.broadcast %cst_3 : f32 to vector<16x1xf32>
    %10 = arith.mulf %8, %9 : vector<16x1xf32>
    %11 = arith.mulf %5, %5 : vector<16x1xf32>
    %12 = arith.subf %10, %11 : vector<16x1xf32>
    %cst_4 = arith.constant 0.000000e+00 : f32
    %13 = vector.broadcast %cst_4 : f32 to vector<16x1xf32>
    %14 = arith.maximumf %12, %13 : vector<16x1xf32>
    %cst_5 = arith.constant 9.99999974E-6 : f32
    %15 = vector.broadcast %cst_5 : f32 to vector<16x1xf32>
    %16 = arith.addf %14, %15 : vector<16x1xf32>
    %17 = math.rsqrt %16 : vector<16x1xf32>
    %18 = vector.broadcast %5 : vector<16x1xf32> to vector<16x128xf32>
    %19 = arith.subf %1, %18 : vector<16x128xf32>
    %20 = vector.broadcast %17 : vector<16x1xf32> to vector<16x128xf32>
    %21 = arith.mulf %19, %20 : vector<16x128xf32>
    %c0_6 = arith.constant 0 : index
    %c0_7 = arith.constant 0 : index
    %22 = vector.load %arg2[%c0_6, %c0_7] : memref<1x128xf32, #tpu.memory_space<vmem>>, vector<1x128xf32>
    %23 = vector.broadcast %22 : vector<1x128xf32> to vector<16x128xf32>
    %24 = arith.mulf %21, %23 : vector<16x128xf32>
    %c0_8 = arith.constant 0 : index
    %c0_9 = arith.constant 0 : index
    %25 = vector.load %arg3[%c0_8, %c0_9] : memref<1x128xf32, #tpu.memory_space<vmem>>, vector<1x128xf32>
    %26 = vector.broadcast %25 : vector<1x128xf32> to vector<16x128xf32>
    %27 = arith.addf %24, %26 : vector<16x128xf32>
    %28 = arith.truncf %27 : vector<16x128xf32> to vector<16x128xbf16>
    %c0_10 = arith.constant 0 : index
    %c0_11 = arith.constant 0 : index
    %29 = vector.load %arg4[%c0_10, %c0_11] : memref<128x128xbf16, #tpu.memory_space<vmem>>, vector<128x128xbf16>
    %cst_12 = arith.constant dense<0.000000e+00> : vector<16x128xf32>
    %30 = tpu.matmul %28, %29, %cst_12 {dimension_numbers = #tpu.dot_dimension_numbers<[1], [0], [0], [1], [0, 0, 1, 1], [], []>} : vector<16x128xbf16>, vector<128x128xbf16>, vector<16x128xf32> -> vector<16x128xf32>
    %c0_13 = arith.constant 0 : index
    %c0_14 = arith.constant 0 : index
    %31 = vector.load %arg5[%c0_13, %c0_14] : memref<1x128xf32, #tpu.memory_space<vmem>>, vector<1x128xf32>
    %32 = vector.broadcast %31 : vector<1x128xf32> to vector<16x128xf32>
    %33 = arith.addf %30, %32 : vector<16x128xf32>
    %cst_15 = arith.constant 0.000000e+00 : f32
    %34 = vector.broadcast %cst_15 : f32 to vector<16x128xf32>
    %35 = arith.maximumf %33, %34 : vector<16x128xf32>
    %36 = arith.truncf %35 : vector<16x128xf32> to vector<16x128xbf16>
    %c0_16 = arith.constant 0 : index
    %c0_17 = arith.constant 0 : index
    %37 = vector.load %arg6[%c0_16, %c0_17] : memref<128x128xbf16, #tpu.memory_space<vmem>>, vector<128x128xbf16>
    %cst_18 = arith.constant dense<0.000000e+00> : vector<16x128xf32>
    %38 = tpu.matmul %36, %37, %cst_18 {dimension_numbers = #tpu.dot_dimension_numbers<[1], [0], [0], [1], [0, 0, 1, 1], [], []>} : vector<16x128xbf16>, vector<128x128xbf16>, vector<16x128xf32> -> vector<16x128xf32>
    %c0_19 = arith.constant 0 : index
    %c0_20 = arith.constant 0 : index
    %39 = vector.load %arg7[%c0_19, %c0_20] : memref<1x128xf32, #tpu.memory_space<vmem>>, vector<1x128xf32>
    %40 = vector.broadcast %39 : vector<1x128xf32> to vector<16x128xf32>
    %41 = arith.addf %38, %40 : vector<16x128xf32>
    %cst_21 = arith.constant 0.000000e+00 : f32
    %42 = vector.broadcast %cst_21 : f32 to vector<16x128xf32>
    %43 = arith.maximumf %41, %42 : vector<16x128xf32>
    %44 = arith.truncf %43 : vector<16x128xf32> to vector<16x128xbf16>
    %c0_22 = arith.constant 0 : index
    %c0_23 = arith.constant 0 : index
    %45 = vector.load %arg8[%c0_22, %c0_23] : memref<128x50xbf16, #tpu.memory_space<vmem>>, vector<128x50xbf16>
    %cst_24 = arith.constant dense<0.000000e+00> : vector<16x50xf32>
    %46 = tpu.matmul %44, %45, %cst_24 {dimension_numbers = #tpu.dot_dimension_numbers<[1], [0], [0], [1], [0, 0, 1, 1], [], []>} : vector<16x128xbf16>, vector<128x50xbf16>, vector<16x50xf32> -> vector<16x50xf32>
    %c0_25 = arith.constant 0 : index
    %c0_26 = arith.constant 0 : index
    %47 = vector.load %arg9[%c0_25, %c0_26] : memref<1x50xf32, #tpu.memory_space<vmem>>, vector<1x50xf32>
    %48 = vector.broadcast %47 : vector<1x50xf32> to vector<16x50xf32>
    %49 = arith.addf %46, %48 : vector<16x50xf32>
    %50 = arith.truncf %49 : vector<16x50xf32> to vector<16x50xbf16>
    %c0_27 = arith.constant 0 : index
    %c0_28 = arith.constant 0 : index
    %51 = vector.load %arg10[%c0_27, %c0_28] : memref<16x50xbf16, #tpu.memory_space<vmem>>, vector<16x50xbf16>
    tpu.vector_store %arg10[%c0_27, %c0_28], %50 {strides = array<i32>} : memref<16x50xbf16, #tpu.memory_space<vmem>>, vector<16x50xbf16>,
    return
  }
  func.func @transform_0(%arg0: i32) -> (i32, i32) {
    %c0_i32 = arith.constant 0 : i32
    %c0_i32_0 = arith.constant 0 : i32
    return %arg0, %c0_i32 : i32, i32
  }
  func.func @transform_1(%arg0: i32) -> (i32, i32) {
    %c0_i32 = arith.constant 0 : i32
    %c0_i32_0 = arith.constant 0 : i32
    %c0_i32_1 = arith.constant 0 : i32
    return %c0_i32, %c0_i32_0 : i32, i32
  }
  func.func @transform_2(%arg0: i32) -> (i32, i32) {
    %c0_i32 = arith.constant 0 : i32
    %c0_i32_0 = arith.constant 0 : i32
    %c0_i32_1 = arith.constant 0 : i32
    return %c0_i32, %c0_i32_0 : i32, i32
  }
  func.func @transform_3(%arg0: i32) -> (i32, i32) {
    %c0_i32 = arith.constant 0 : i32
    %c0_i32_0 = arith.constant 0 : i32
    %c0_i32_1 = arith.constant 0 : i32
    return %c0_i32, %c0_i32_0 : i32, i32
  }
  func.func @transform_4(%arg0: i32) -> (i32, i32) {
    %c0_i32 = arith.constant 0 : i32
    %c0_i32_0 = arith.constant 0 : i32
    %c0_i32_1 = arith.constant 0 : i32
    return %c0_i32, %c0_i32_0 : i32, i32
  }
  func.func @transform_5(%arg0: i32) -> (i32, i32) {
    %c0_i32 = arith.constant 0 : i32
    %c0_i32_0 = arith.constant 0 : i32
    %c0_i32_1 = arith.constant 0 : i32
    return %c0_i32, %c0_i32_0 : i32, i32
  }
  func.func @transform_6(%arg0: i32) -> (i32, i32) {
    %c0_i32 = arith.constant 0 : i32
    %c0_i32_0 = arith.constant 0 : i32
    %c0_i32_1 = arith.constant 0 : i32
    return %c0_i32, %c0_i32_0 : i32, i32
  }
  func.func @transform_7(%arg0: i32) -> (i32, i32) {
    %c0_i32 = arith.constant 0 : i32
    %c0_i32_0 = arith.constant 0 : i32
    %c0_i32_1 = arith.constant 0 : i32
    return %c0_i32, %c0_i32_0 : i32, i32
  }
  func.func @transform_8(%arg0: i32) -> (i32, i32) {
    %c0_i32 = arith.constant 0 : i32
    %c0_i32_0 = arith.constant 0 : i32
    %c0_i32_1 = arith.constant 0 : i32
    return %c0_i32, %c0_i32_0 : i32, i32
  }
  func.func @transform_9(%arg0: i32) -> (i32, i32) {
    %c0_i32 = arith.constant 0 : i32
    %c0_i32_0 = arith.constant 0 : i32
    return %arg0, %c0_i32 : i32, i32
  }
}

</mosaic_0001>

<bundles_post_ra>
// kernel: tpu_custom_call.1
= control target key start
LH: loop header
LB: loop body
LE: loop exit
PB: predicated region body
PF: predicated region fallthrough
CT: control target
= control target key end

     0   :  { %14 = vsyncpa [#allocation3], 0  ;;  %s721_s0 = inlined_call_operand.vmem [shape: bf16[16,128], index: 0, kind: input, shape index: {}]   ;;  %s722_s1 = inlined_call_operand.vmem [shape: f32[1,128], index: 1, kind: input, shape index: {}]   ;;  %s723_s2 = inlined_call_operand.vmem [shape: f32[1,128], index: 2, kind: input, shape index: {}]   ;;  %s724_s3 = inlined_call_operand.vmem [shape: bf16[128,128], index: 3, kind: input, shape index: {}]   ;;  %s725_s4 = inlined_call_operand.vmem [shape: f32[1,128], index: 4, kind: input, shape index: {}]   ;;  %s726_s5 = inlined_call_operand.hbm [shape: bf16[128,128], index: 5, kind: input, shape index: {}]   ;;  %s727_s6 = inlined_call_operand.vmem [shape: f32[1,128], index: 6, kind: input, shape index: {}]   ;;  %s728_s7 = inlined_call_operand.vmem [shape: bf16[128,50], index: 7, kind: input, shape index: {}]   ;;  %s729_s8 = inlined_call_operand.vmem [shape: f32[1,50], index: 8, kind: input, shape index: {}]   ;;  %s730_s9 = inlined_call_operand.hbm [shape: bf16[16,50], index: 9, kind: output, shape index: {}]  }
   0x1   :  { %15 = vsyncpa [#allocation4], 0  ;;  %s30_s11 = sshll.u32 %s726_s5, 4  ;;  %s577_s12 = smov [#allocation2]   ;;  %s31_s11 = int_to_ptr.hbm [resolvable:$true] %s30_s11 }
   0x2   :  { %s32_s13 = sshll.u32 %s577_s12, 4  ;;  %s578_s14 = smov 64   ;;  %s33_s13 = int_to_ptr.vmem [resolvable:$true] %s32_s13 }
   0x3   :  { %s579_s15 = smov 4  }
   0x4   :  { %38 = dma.hbm_to_vmem [thread:$0]  %s31_s11, 1024, %s33_s13, [#allocation3], %s578_s14, %s578_s14, %s579_s15  }
   0x5   :  { %573 = dma.done.wait [#allocation3], 1024  }
   0x6   :  { %574 = vsyncadd [#allocation3], 4294966272  ;;  %v509_v0 = vld [vmem:[%s721_s0] sm:$0xff]   ;;  %v491_v5 = vld [vmem:[%s724_s3 + $0x38] sm:$0xff]  ;;  %vm366_vm6 = vcmask 404480   ;;  %s375_s13 = sshll.u32 %s730_s9, 4  ;;  %s376_s13 = int_to_ptr.hbm [resolvable:$true] %s375_s13 }
   0x7   :  { %v640_v1 = vunpack.c.l.bf16 %v509_v0  ;;  %v645_v3 = vunpack.c.h.bf16 %v509_v0  ;;  %180 = vmatpush.bf16.msra.mxu0 %v491_v5  ;;  %v490_v6 = vld [vmem:[%s724_s3 + $0x30] sm:$0xff]  ;;  %v489_v7 = vld [vmem:[%s724_s3 + $0x28] sm:$0xff]  ;;  %v488_v8 = vld [vmem:[%s724_s3 + $0x20] sm:$0xff] }
   0x8   :  { %v487_v9 = vld [vmem:[%s724_s3 + $0x18] sm:$0xff]  ;;  %v486_v12 = vld [vmem:[%s724_s3 + $0x10] sm:$0xff]  ;;  %v485_v16 = vld [vmem:[%s724_s3 + $0x8] sm:$0xff] }
   0x9   :  { %53 = vadd.xlane.f32.xlu0 %v640_v1  ;;  %v59_v2 = vmul.f32 %v640_v1, %v640_v1  ;;  %v60_v4 = vmul.f32 %v645_v3, %v645_v3  ;;  %v484_v19 = vld [vmem:[%s724_s3] sm:$0xff]  ;;  %v499_v27 = vld [vmem:[#allocation2 + $0x38] sm:$0xff]  ;;  %v498_v29 = vld [vmem:[#allocation2 + $0x30] sm:$0xff] }
   0xa   :  { %265 = vmatpush.bf16.msra.mxu1 %v499_v27  ;;  %v497_v34 = vld [vmem:[#allocation2 + $0x28] sm:$0xff]  ;;  %v496_v37 = vld [vmem:[#allocation2 + $0x20] sm:$0xff]  ;;  %v495_v58 = vld [vmem:[#allocation2 + $0x18] sm:$0xff] }
   0xb   :  { %61 = vadd.xlane.f32.xlu1 %v59_v2  ;;  %181 = vmatpush.bf16.msra.mxu0 %v490_v6  ;;  %v516_v47 = vld [vmem:[%s722_s1] ss:$0 sm:$0xff]  ;;  %v494_v59 = vld [vmem:[#allocation2 + $0x10] sm:$0xff]  ;;  %v493_v60 = vld [vmem:[#allocation2 + $0x8] sm:$0xff] }
   0xc   :  { %v517_v53 = vld [vmem:[%s723_s2] ss:$0 sm:$0xff]  ;;  %v507_v62 = vld [vmem:[%s728_s7 + $0x38] sm:$0xff]  ;;  %v506_v63 = vld [vmem:[%s728_s7 + $0x30] sm:$0xff] }
   0xd   :  { %v492_v61 = vld [vmem:[#allocation2] sm:$0xff]  ;;  %350 = vmatpush.bf16.msra.mxu2 %v507_v62  ;;  %v505_v0 = vld [vmem:[%s728_s7 + $0x28] sm:$0xff] }
   0xe   :  { %266 = vmatpush.bf16.msra.mxu1 %v498_v29 }
   0xf   :  { %182 = vmatpush.bf16.msra.mxu0 %v489_v7 }
  0x11   :  { %55 = vadd.xlane.f32.xlu0 %v645_v3  ;;  %351 = vmatpush.bf16.msra.mxu2 %v506_v63 }
  0x12   :  { %267 = vmatpush.bf16.msra.mxu1 %v497_v34 }
  0x13   :  { %63 = vadd.xlane.f32.xlu1 %v60_v4  ;;  %183 = vmatpush.bf16.msra.mxu0 %v488_v8 }
  0x15   :  { %352 = vmatpush.bf16.msra.mxu2 %v505_v0 }
  0x16   :  { %268 = vmatpush.bf16.msra.mxu1 %v496_v37 }
  0x17   :  { %184 = vmatpush.bf16.msra.mxu0 %v487_v9 }
  0x1a   :  { %269 = vmatpush.bf16.msra.mxu1 %v495_v58 }
  0x1b   :  { %185 = vmatpush.bf16.msra.mxu0 %v486_v12  ;;  %v501_v12 = vld [vmem:[%s728_s7 + $0x8] sm:$0xff] }
  0x1e   :  { %270 = vmatpush.bf16.msra.mxu1 %v494_v59 }
  0x1f   :  { %186 = vmatpush.bf16.msra.mxu0 %v485_v16 }
  0x22   :  { %271 = vmatpush.bf16.msra.mxu1 %v493_v60 }
  0x23   :  { %187 = vmatpush.bf16.msra.mxu0 %v484_v19 }
  0x26   :  { %272 = vmatpush.bf16.msra.mxu1 %v492_v61 }
  0x7c   :  { %v54_v10 = vpop.xlane.xlu0 %53 }
  0x7d   :  { %v57_v11 = vmul.f32 0.03125, %v54_v10  ;;  %v503_v10 = vld [vmem:[%s728_s7 + $0x18] sm:$0xff] }
  0x7e   :  { %v62_v13 = vpop.xlane.xlu1 %61 }
  0x7f   :  { %v67_v14 = vmul.f32 %v57_v11, %v57_v11  ;;  %v65_v15 = vmul.f32 0.03125, %v62_v13  ;;  %v95_v44 = vsub.f32 %v640_v1, %v57_v11  ;;  %v504_v1 = vld [vmem:[%s728_s7 + $0x20] sm:$0xff]  ;;  %v502_v11 = vld [vmem:[%s728_s7 + $0x10] sm:$0xff] }
  0x80   :  { %353 = vmatpush.bf16.msra.mxu2 %v504_v1  ;;  %v500_v13 = vld [vmem:[%s728_s7] sm:$0xff]  ;;  %s580_s7 = smov [#allocation5]  }
  0x81   :  { %v69_v17 = vsub.f32 %v65_v15, %v67_v14  ;;  %v519_v15 = vld [vmem:[%s727_s6] ss:$0 sm:$0xff]  ;;  %s373_s11 = sshll.u32 %s580_s7, 4  ;;  %s374_s11 = int_to_ptr.vmem [resolvable:$true] %s373_s11 }
  0x83   :  { %v71_v18 = vmax.f32 %v69_v17, 0.0 }
  0x84   :  { %v56_v20 = vpop.xlane.xlu0 %55  ;;  %354 = vmatpush.bf16.msra.mxu2 %v503_v10 }
  0x85   :  { %v73_v21 = vadd.f32 1e-05, %v71_v18  ;;  %v58_v22 = vmul.f32 0.03125, %v56_v20 }
  0x86   :  { %v64_v23 = vpop.xlane.xlu1 %63 }
  0x87   :  { %521 = vrsqrt.f32 %v73_v21  ;;  %v68_v24 = vmul.f32 %v58_v22, %v58_v22  ;;  %v66_v25 = vmul.f32 0.03125, %v64_v23  ;;  %vm81_vm1 = vweird.f32 %v73_v21 }
  0x88   :  { %v96_v49 = vsub.f32 %v645_v3, %v58_v22  ;;  %v518_v3 = vld [vmem:[%s725_s4] ss:$0 sm:$0xff]  ;;  %355 = vmatpush.bf16.msra.mxu2 %v502_v11 }
  0x89   :  { %v70_v26 = vsub.f32 %v66_v25, %v68_v24  ;;  %v520_v22 = vld [vmem:[%s729_s8] ss:$0 sm:$0xff] }
  0x8b   :  { %v72_v28 = vmax.f32 %v70_v26, 0.0 }
  0x8c   :  { %356 = vmatpush.bf16.msra.mxu2 %v501_v12 }
  0x8d   :  { %v522_v30 = vpop.eup %521  ;;  %v74_v32 = vadd.f32 1e-05, %v72_v28 }
  0x8e   :  { %v76_v31 = vmul.f32 %v522_v30, %v73_v21  ;;  %vm82_vm0 = vweird.f32 %v522_v30 }
  0x8f   :  { %523 = vrsqrt.f32 %v74_v32  ;;  %vm83_vm2 = vmor %vm81_vm1, %vm82_vm0  ;;  %vm91_vm4 = vweird.f32 %v74_v32 }
  0x90   :  { %v77_v33 = vmul.f32 %v522_v30, %v76_v31  ;;  %357 = vmatpush.bf16.msra.mxu2 %v500_v13 }
  0x92   :  { %v78_v35 = vmul.f32 0.5, %v77_v33 }
  0x94   :  { %v79_v36 = vsub.f32 1.5, %v78_v35 }
  0x95   :  { %v524_v38 = vpop.eup %523 }
  0x96   :  { %v86_v39 = vmul.f32 %v524_v38, %v74_v32  ;;  %v80_v40 = vmul.f32 %v522_v30, %v79_v36  ;;  %vm92_vm3 = vweird.f32 %v524_v38 }
  0x97   :  { %vm93_vm5 = vmor %vm91_vm4, %vm92_vm3 }
  0x98   :  { %v87_v41 = vmul.f32 %v524_v38, %v86_v39  ;;  %v84_v43 = vsel %vm83_vm2, %v522_v30, %v80_v40 }
  0x99   :  { %v97_v46 = vmul.f32 %v95_v44, %v84_v43 }
  0x9a   :  { %v88_v42 = vmul.f32 0.5, %v87_v41 }
  0x9b   :  { %v103_v52 = vmul.f32 %v516_v47, %v97_v46 }
  0x9c   :  { %v89_v45 = vsub.f32 1.5, %v88_v42 }
  0x9d   :  { %v109_v55 = vadd.f32 %v517_v53, %v103_v52 }
  0x9e   :  { %v90_v48 = vmul.f32 %v524_v38, %v89_v45 }
  0xa0   :  { %v94_v50 = vsel %vm93_vm5, %v524_v38, %v90_v48 }
  0xa1   :  { %v98_v51 = vmul.f32 %v96_v49, %v94_v50 }
  0xa3   :  { %v104_v54 = vmul.f32 %v516_v47, %v98_v51 }
  0xa5   :  { %v110_v56 = vadd.f32 %v517_v53, %v104_v54 }
  0xa7   :  { %v111_v57 = vpack.c.bf16 %v110_v56, %v109_v55 }
  0xa9   :  { %188 = vmatmul.bf16.vlgmr.msra.gmra.mxu0 %v111_v57 }
 0x126   :  { %v189_v2 = vpop.f32.mrf.mxu0 }
 0x127   :  { %v190_v4 = vadd.f32 %v518_v3, %v189_v2 }
 0x129   :  { %v194_v7 = vmax.f32 %v190_v4, 0.0 }
 0x12e   :  { %v191_v5 = vpop.f32.mrf.mxu0 }
 0x12f   :  { %v192_v6 = vadd.f32 %v518_v3, %v191_v5 }
 0x131   :  { %v195_v8 = vmax.f32 %v192_v6, 0.0 }
 0x133   :  { %v196_v9 = vpack.c.bf16 %v195_v8, %v194_v7 }
 0x135   :  { %273 = vmatmul.bf16.vlgmr.msra.gmra.mxu1 %v196_v9 }
 0x1b2   :  { %v274_v14 = vpop.f32.mrf.mxu1 }
 0x1b3   :  { %v275_v16 = vadd.f32 %v519_v15, %v274_v14 }
 0x1b5   :  { %v279_v19 = vmax.f32 %v275_v16, 0.0 }
 0x1ba   :  { %v276_v17 = vpop.f32.mrf.mxu1 }
 0x1bb   :  { %v277_v18 = vadd.f32 %v519_v15, %v276_v17 }
 0x1bd   :  { %v280_v20 = vmax.f32 %v277_v18, 0.0 }
 0x1bf   :  { %v281_v21 = vpack.c.bf16 %v280_v20, %v279_v19 }
 0x1c1   :  { %358 = vmatmul.bf16.vlgmr.msra.gmra.mxu2 %v281_v21 }
 0x244   :  { %v359_v23 = vpop.f32.mrf.mxu2 }
 0x245   :  { %v360_v24 = vadd.f32 %v520_v22, %v359_v23 }
 0x247   :  { %v364_v25 = vpack.c.bf16 %v360_v24, %v360_v24 }
 0x249   :  { %367 = vst.msk [vmem:[#allocation5] sm:$0xf] %vm366_vm6, %v364_v25 }
 0x24c   :  { %v361_v26 = vpop.f32.mrf.mxu2 }
 0x24d   :  { %v362_v27 = vadd.f32 %v520_v22, %v361_v26 }
 0x24f   :  { %v365_v28 = vpack.c.bf16 %v362_v27, %v362_v27 }
 0x251   :  { %368 = vst.msk [vmem:[#allocation5 + $0x4] sm:$0xf] %vm366_vm6, %v365_v28 }
 0x252   :  { %381 = dma.vmem_to_hbm [thread:$0]  %s374_s11, 128, %s376_s13, [#allocation4], %s578_s14, %s578_s14, %s579_s15  }
 0x253   :  { %575 = dma.done.wait [#allocation4], 128  }
 0x254   :  { %576 = vsyncadd [#allocation4], 4294967168 }
 0x255   :  { %386 = vsyncpa [#allocation3], 1 }
 0x256   :  { %387 = vsyncpa [#allocation4], 1 }

// kernel: tpu_custom_call.1
= control target key start
LH: loop header
LB: loop body
LE: loop exit
PB: predicated region body
PF: predicated region fallthrough
CT: control target
= control target key end

     0   :  { %14 = vsyncpa [#allocation3], 0  ;;  %s721_s0 = inlined_call_operand.vmem [shape: bf16[16,128], index: 0, kind: input, shape index: {}]   ;;  %s722_s1 = inlined_call_operand.vmem [shape: f32[1,128], index: 1, kind: input, shape index: {}]   ;;  %s723_s2 = inlined_call_operand.vmem [shape: f32[1,128], index: 2, kind: input, shape index: {}]   ;;  %s724_s3 = inlined_call_operand.vmem [shape: bf16[128,128], index: 3, kind: input, shape index: {}]   ;;  %s725_s4 = inlined_call_operand.vmem [shape: f32[1,128], index: 4, kind: input, shape index: {}]   ;;  %s726_s5 = inlined_call_operand.hbm [shape: bf16[128,128], index: 5, kind: input, shape index: {}]   ;;  %s727_s6 = inlined_call_operand.vmem [shape: f32[1,128], index: 6, kind: input, shape index: {}]   ;;  %s728_s7 = inlined_call_operand.vmem [shape: bf16[128,50], index: 7, kind: input, shape index: {}]   ;;  %s729_s8 = inlined_call_operand.vmem [shape: f32[1,50], index: 8, kind: input, shape index: {}]   ;;  %s730_s9 = inlined_call_operand.hbm [shape: bf16[16,50], index: 9, kind: output, shape index: {}]  }
   0x1   :  { %15 = vsyncpa [#allocation4], 0  ;;  %s30_s11 = sshll.u32 %s726_s5, 4  ;;  %s577_s12 = smov [#allocation2]   ;;  %s31_s11 = int_to_ptr.hbm [resolvable:$true] %s30_s11 }
   0x2   :  { %s32_s13 = sshll.u32 %s577_s12, 4  ;;  %s578_s14 = smov 64   ;;  %s33_s13 = int_to_ptr.vmem [resolvable:$true] %s32_s13 }
   0x3   :  { %s579_s15 = smov 4  }
   0x4   :  { %38 = dma.hbm_to_vmem [thread:$0]  %s31_s11, 1024, %s33_s13, [#allocation3], %s578_s14, %s578_s14, %s579_s15  }
   0x5   :  { %573 = dma.done.wait [#allocation3], 1024  }
   0x6   :  { %574 = vsyncadd [#allocation3], 4294966272  ;;  %v509_v0 = vld [vmem:[%s721_s0] sm:$0xff]   ;;  %v491_v5 = vld [vmem:[%s724_s3 + $0x38] sm:$0xff]  ;;  %vm366_vm6 = vcmask 404480   ;;  %s375_s13 = sshll.u32 %s730_s9, 4  ;;  %s376_s13 = int_to_ptr.hbm [resolvable:$true] %s375_s13 }
   0x7   :  { %v640_v1 = vunpack.c.l.bf16 %v509_v0  ;;  %v645_v3 = vunpack.c.h.bf16 %v509_v0  ;;  %180 = vmatpush.bf16.msra.mxu0 %v491_v5  ;;  %v490_v6 = vld [vmem:[%s724_s3 + $0x30] sm:$0xff]  ;;  %v489_v7 = vld [vmem:[%s724_s3 + $0x28] sm:$0xff]  ;;  %v488_v8 = vld [vmem:[%s724_s3 + $0x20] sm:$0xff] }
   0x8   :  { %v487_v9 = vld [vmem:[%s724_s3 + $0x18] sm:$0xff]  ;;  %v486_v12 = vld [vmem:[%s724_s3 + $0x10] sm:$0xff]  ;;  %v485_v16 = vld [vmem:[%s724_s3 + $0x8] sm:$0xff] }
   0x9   :  { %53 = vadd.xlane.f32.xlu0 %v640_v1  ;;  %v59_v2 = vmul.f32 %v640_v1, %v640_v1  ;;  %v60_v4 = vmul.f32 %v645_v3, %v645_v3  ;;  %v484_v19 = vld [vmem:[%s724_s3] sm:$0xff]  ;;  %v499_v27 = vld [vmem:[#allocation2 + $0x38] sm:$0xff]  ;;  %v498_v29 = vld [vmem:[#allocation2 + $0x30] sm:$0xff] }
   0xa   :  { %265 = vmatpush.bf16.msra.mxu1 %v499_v27  ;;  %v497_v34 = vld [vmem:[#allocation2 + $0x28] sm:$0xff]  ;;  %v496_v37 = vld [vmem:[#allocation2 + $0x20] sm:$0xff]  ;;  %v495_v58 = vld [vmem:[#allocation2 + $0x18] sm:$0xff] }
   0xb   :  { %61 = vadd.xlane.f32.xlu1 %v59_v2  ;;  %181 = vmatpush.bf16.msra.mxu0 %v490_v6  ;;  %v516_v47 = vld [vmem:[%s722_s1] ss:$0 sm:$0xff]  ;;  %v494_v59 = vld [vmem:[#allocation2 + $0x10] sm:$0xff]  ;;  %v493_v60 = vld [vmem:[#allocation2 + $0x8] sm:$0xff] }
   0xc   :  { %v517_v53 = vld [vmem:[%s723_s2] ss:$0 sm:$0xff]  ;;  %v507_v62 = vld [vmem:[%s728_s7 + $0x38] sm:$0xff]  ;;  %v506_v63 = vld [vmem:[%s728_s7 + $0x30] sm:$0xff] }
   0xd   :  { %v492_v61 = vld [vmem:[#allocation2] sm:$0xff]  ;;  %350 = vmatpush.bf16.msra.mxu2 %v507_v62  ;;  %v505_v0 = vld [vmem:[%s728_s7 + $0x28] sm:$0xff] }
   0xe   :  { %266 = vmatpush.bf16.msra.mxu1 %v498_v29 }
   0xf   :  { %182 = vmatpush.bf16.msra.mxu0 %v489_v7 }
  0x11   :  { %55 = vadd.xlane.f32.xlu0 %v645_v3  ;;  %351 = vmatpush.bf16.msra.mxu2 %v506_v63 }
  0x12   :  { %267 = vmatpush.bf16.msra.mxu1 %v497_v34 }
  0x13   :  { %63 = vadd.xlane.f32.xlu1 %v60_v4  ;;  %183 = vmatpush.bf16.msra.mxu0 %v488_v8 }
  0x15   :  { %352 = vmatpush.bf16.msra.mxu2 %v505_v0 }
  0x16   :  { %268 = vmatpush.bf16.msra.mxu1 %v496_v37 }
  0x17   :  { %184 = vmatpush.bf16.msra.mxu0 %v487_v9 }
  0x1a   :  { %269 = vmatpush.bf16.msra.mxu1 %v495_v58 }
  0x1b   :  { %185 = vmatpush.bf16.msra.mxu0 %v486_v12  ;;  %v501_v12 = vld [vmem:[%s728_s7 + $0x8] sm:$0xff] }
  0x1e   :  { %270 = vmatpush.bf16.msra.mxu1 %v494_v59 }
  0x1f   :  { %186 = vmatpush.bf16.msra.mxu0 %v485_v16 }
  0x22   :  { %271 = vmatpush.bf16.msra.mxu1 %v493_v60 }
  0x23   :  { %187 = vmatpush.bf16.msra.mxu0 %v484_v19 }
  0x26   :  { %272 = vmatpush.bf16.msra.mxu1 %v492_v61 }
  0x7c   :  { %v54_v10 = vpop.xlane.xlu0 %53 }
  0x7d   :  { %v57_v11 = vmul.f32 0.03125, %v54_v10  ;;  %v503_v10 = vld [vmem:[%s728_s7 + $0x18] sm:$0xff] }
  0x7e   :  { %v62_v13 = vpop.xlane.xlu1 %61 }
  0x7f   :  { %v67_v14 = vmul.f32 %v57_v11, %v57_v11  ;;  %v65_v15 = vmul.f32 0.03125, %v62_v13  ;;  %v95_v44 = vsub.f32 %v640_v1, %v57_v11  ;;  %v504_v1 = vld [vmem:[%s728_s7 + $0x20] sm:$0xff]  ;;  %v502_v11 = vld [vmem:[%s728_s7 + $0x10] sm:$0xff] }
  0x80   :  { %353 = vmatpush.bf16.msra.mxu2 %v504_v1  ;;  %v500_v13 = vld [vmem:[%s728_s7] sm:$0xff]  ;;  %s580_s7 = smov [#allocation5]  }
  0x81   :  { %v69_v17 = vsub.f32 %v65_v15, %v67_v14  ;;  %v519_v15 = vld [vmem:[%s727_s6] ss:$0 sm:$0xff]  ;;  %s373_s11 = sshll.u32 %s580_s7, 4  ;;  %s374_s11 = int_to_ptr.vmem [resolvable:$true] %s373_s11 }
  0x83   :  { %v71_v18 = vmax.f32 %v69_v17, 0.0 }
  0x84   :  { %v56_v20 = vpop.xlane.xlu0 %55  ;;  %354 = vmatpush.bf16.msra.mxu2 %v503_v10 }
  0x85   :  { %v73_v21 = vadd.f32 1e-05, %v71_v18  ;;  %v58_v22 = vmul.f32 0.03125, %v56_v20 }
  0x86   :  { %v64_v23 = vpop.xlane.xlu1 %63 }
  0x87   :  { %521 = vrsqrt.f32 %v73_v21  ;;  %v68_v24 = vmul.f32 %v58_v22, %v58_v22  ;;  %v66_v25 = vmul.f32 0.03125, %v64_v23  ;;  %vm81_vm1 = vweird.f32 %v73_v21 }
  0x88   :  { %v96_v49 = vsub.f32 %v645_v3, %v58_v22  ;;  %v518_v3 = vld [vmem:[%s725_s4] ss:$0 sm:$0xff]  ;;  %355 = vmatpush.bf16.msra.mxu2 %v502_v11 }
  0x89   :  { %v70_v26 = vsub.f32 %v66_v25, %v68_v24  ;;  %v520_v22 = vld [vmem:[%s729_s8] ss:$0 sm:$0xff] }
  0x8b   :  { %v72_v28 = vmax.f32 %v70_v26, 0.0 }
  0x8c   :  { %356 = vmatpush.bf16.msra.mxu2 %v501_v12 }
  0x8d   :  { %v522_v30 = vpop.eup %521  ;;  %v74_v32 = vadd.f32 1e-05, %v72_v28 }
  0x8e   :  { %v76_v31 = vmul.f32 %v522_v30, %v73_v21  ;;  %vm82_vm0 = vweird.f32 %v522_v30 }
  0x8f   :  { %523 = vrsqrt.f32 %v74_v32  ;;  %vm83_vm2 = vmor %vm81_vm1, %vm82_vm0  ;;  %vm91_vm4 = vweird.f32 %v74_v32 }
  0x90   :  { %v77_v33 = vmul.f32 %v522_v30, %v76_v31  ;;  %357 = vmatpush.bf16.msra.mxu2 %v500_v13 }
  0x92   :  { %v78_v35 = vmul.f32 0.5, %v77_v33 }
  0x94   :  { %v79_v36 = vsub.f32 1.5, %v78_v35 }
  0x95   :  { %v524_v38 = vpop.eup %523 }
  0x96   :  { %v86_v39 = vmul.f32 %v524_v38, %v74_v32  ;;  %v80_v40 = vmul.f32 %v522_v30, %v79_v36  ;;  %vm92_vm3 = vweird.f32 %v524_v38 }
  0x97   :  { %vm93_vm5 = vmor %vm91_vm4, %vm92_vm3 }
  0x98   :  { %v87_v41 = vmul.f32 %v524_v38, %v86_v39  ;;  %v84_v43 = vsel %vm83_vm2, %v522_v30, %v80_v40 }
  0x99   :  { %v97_v46 = vmul.f32 %v95_v44, %v84_v43 }
  0x9a   :  { %v88_v42 = vmul.f32 0.5, %v87_v41 }
  0x9b   :  { %v103_v52 = vmul.f32 %v516_v47, %v97_v46 }
  0x9c   :  { %v89_v45 = vsub.f32 1.5, %v88_v42 }
  0x9d   :  { %v109_v55 = vadd.f32 %v517_v53, %v103_v52 }
  0x9e   :  { %v90_v48 = vmul.f32 %v524_v38, %v89_v45 }
  0xa0   :  { %v94_v50 = vsel %vm93_vm5, %v524_v38, %v90_v48 }
  0xa1   :  { %v98_v51 = vmul.f32 %v96_v49, %v94_v50 }
  0xa3   :  { %v104_v54 = vmul.f32 %v516_v47, %v98_v51 }
  0xa5   :  { %v110_v56 = vadd.f32 %v517_v53, %v104_v54 }
  0xa7   :  { %v111_v57 = vpack.c.bf16 %v110_v56, %v109_v55 }
  0xa9   :  { %188 = vmatmul.bf16.vlgmr.msra.gmra.mxu0 %v111_v57 }
 0x126   :  { %v189_v2 = vpop.f32.mrf.mxu0 }
 0x127   :  { %v190_v4 = vadd.f32 %v518_v3, %v189_v2 }
 0x129   :  { %v194_v7 = vmax.f32 %v190_v4, 0.0 }
 0x12e   :  { %v191_v5 = vpop.f32.mrf.mxu0 }
 0x12f   :  { %v192_v6 = vadd.f32 %v518_v3, %v191_v5 }
 0x131   :  { %v195_v8 = vmax.f32 %v192_v6, 0.0 }
 0x133   :  { %v196_v9 = vpack.c.bf16 %v195_v8, %v194_v7 }
 0x135   :  { %273 = vmatmul.bf16.vlgmr.msra.gmra.mxu1 %v196_v9 }
 0x1b2   :  { %v274_v14 = vpop.f32.mrf.mxu1 }
 0x1b3   :  { %v275_v16 = vadd.f32 %v519_v15, %v274_v14 }
 0x1b5   :  { %v279_v19 = vmax.f32 %v275_v16, 0.0 }
 0x1ba   :  { %v276_v17 = vpop.f32.mrf.mxu1 }
 0x1bb   :  { %v277_v18 = vadd.f32 %v519_v15, %v276_v17 }
 0x1bd   :  { %v280_v20 = vmax.f32 %v277_v18, 0.0 }
 0x1bf   :  { %v281_v21 = vpack.c.bf16 %v280_v20, %v279_v19 }
 0x1c1   :  { %358 = vmatmul.bf16.vlgmr.msra.gmra.mxu2 %v281_v21 }
 0x244   :  { %v359_v23 = vpop.f32.mrf.mxu2 }
 0x245   :  { %v360_v24 = vadd.f32 %v520_v22, %v359_v23 }
 0x247   :  { %v364_v25 = vpack.c.bf16 %v360_v24, %v360_v24 }
 0x249   :  { %367 = vst.msk [vmem:[#allocation5] sm:$0xf] %vm366_vm6, %v364_v25 }
 0x24c   :  { %v361_v26 = vpop.f32.mrf.mxu2 }
 0x24d   :  { %v362_v27 = vadd.f32 %v520_v22, %v361_v26 }
 0x24f   :  { %v365_v28 = vpack.c.bf16 %v362_v27, %v362_v27 }
 0x251   :  { %368 = vst.msk [vmem:[#allocation5 + $0x4] sm:$0xf] %vm366_vm6, %v365_v28 }
 0x252   :  { %381 = dma.vmem_to_hbm [thread:$0]  %s374_s11, 128, %s376_s13, [#allocation4], %s578_s14, %s578_s14, %s579_s15  }
 0x253   :  { %575 = dma.done.wait [#allocation4], 128  }
 0x254   :  { %576 = vsyncadd [#allocation4], 4294967168 }
 0x255   :  { %386 = vsyncpa [#allocation3], 1 }
 0x256   :  { %387 = vsyncpa [#allocation4], 1 }

</bundles_post_ra>
